<compile_context>
chip_gen: v7x
topology: tpu7x:2x2x1
jax: 0.10.0
libtpu: 0.0.40
codegen_flags: <defaults>
</compile_context>

<pallas_src>
import jax
import jax.numpy as jnp
from jax.experimental import pallas as pl
from jax.experimental.pallas import tpu as pltpu


def _tpu_vmem_capacity_bytes():
    try:
        return int(pltpu.get_tpu_info().vmem_capacity_bytes)
    except Exception:
        return 64 << 20  # conservative fallback (v7x per-TensorCore VMEM)


def _choose_tn(N, elem_bytes, target_bytes, min_steps=8):
    """Batch elements per grid step.

    Aim for ~target_bytes input blocks, but keep >= min_steps grid steps when
    the batch allows so v7x's two TensorCores each get several iterations and
    prefetch of block i+1 / writeback of block i-1 hide behind compute of i.
    """
    tn = max(1, target_bytes // max(1, elem_bytes))
    if N > 1:
        tn = min(tn, max(1, N // min(min_steps, N)))
    return int(min(tn, N))


def se_block(x, w_down, b_down, w_up, b_up):
    """x: (N, C, H, W); w_down: (I, C, 1, 1); b_down: (I,);
       w_up: (C, I, 1, 1); b_up: (C,)."""
    N, C, H, W = x.shape
    I = w_down.shape[0]
    HW = H * W
    itemsize = jnp.dtype(x.dtype).itemsize

    # Lane-dense layout: flattened spatial in the last (lane) dim, padded to a
    # multiple of 128 so every store is an unmasked vst and DMA tiles are
    # dense. No-op (pure reshape) when HW is already a multiple of 128.
    HWp = ((HW + 127) // 128) * 128
    x_flat = x.reshape(N, C, HW)
    if HWp != HW:
        x_flat = jnp.pad(x_flat, ((0, 0), (0, 0), (0, HWp - HW)))

    # 1x1-conv kernels as dense (in x out) matrices, pre-cast to f32 once.
    wd_t = jnp.transpose(w_down.reshape(I, C)).astype(jnp.float32)  # (C, I)
    wu_t = jnp.transpose(w_up.reshape(C, I)).astype(jnp.float32)    # (I, C)
    bd2 = b_down.reshape(1, I).astype(jnp.float32)
    bu2 = b_up.reshape(1, C).astype(jnp.float32)
    # Ones column: turns the average pool into an MXU matmul. The zero-padded
    # spatial tail contributes 0 to the sum; we divide by the true HW.
    ones_col = jnp.ones((HWp, 1), dtype=x.dtype)

    vmem_cap = _tpu_vmem_capacity_bytes()
    vmem_limit = int(min((vmem_cap * 3) // 4, 96 << 20))
    # Footprint ~ 2 input + 2 output double-buffers + temps ~= 5-6x the block.
    target_bytes = int(min(max(vmem_limit // 8, 2 << 20), 8 << 20))

    elem_bytes = C * HWp * itemsize
    TN = _choose_tn(N, elem_bytes, target_bytes)
    grid = (pl.cdiv(N, TN),)
    # TODO(synk): very large single elements (C*HW*itemsize >~ 8 MiB, e.g.
    # C=2048, HW=3136 f32) need a spatial-split two-pass (pool-accumulate then
    # rescale) to fit v7x's 64 MiB VMEM; not implemented here.

    inv_hw = 1.0 / float(HW)

    def kernel(x_ref, ones_ref, wd_ref, bd_ref, wu_ref, bu_ref, out_ref):
        x_blk = x_ref[...]                               # (TN, C, HWp), native dtype
        tn, _, hwp = x_blk.shape

        # Global average pool on the MXU: batched matmul against a ones column
        # with f32 accumulation (no full f32 copy of the block, no XLU reduce
        # over the large lane axis).
        ones3 = jnp.broadcast_to(ones_ref[...][None], (tn, hwp, 1))
        psum = jnp.einsum("nch,nhk->nck", x_blk, ones3,
                          preferred_element_type=jnp.float32)       # (TN, C, 1)
        pooled = jnp.sum(psum, axis=-1) * inv_hw                    # (TN, C) f32

        # down 1x1 conv (dense on pooled vector) + ReLU.
        hidden = jnp.dot(pooled, wd_ref[...],
                         preferred_element_type=jnp.float32) + bd_ref[...]
        hidden = jnp.maximum(hidden, 0.0)                           # (TN, I)

        # up 1x1 conv + sigmoid.
        logits = jnp.dot(hidden, wu_ref[...],
                         preferred_element_type=jnp.float32) + bu_ref[...]
        scale = jax.nn.sigmoid(logits)                              # (TN, C) f32

        # Dominant elementwise rescale in the input's native dtype; result
        # dtype already matches out_ref (no redundant cast).
        out_ref[...] = x_blk * scale[:, :, None].astype(x_blk.dtype)

    cost = pl.CostEstimate(
        flops=3 * N * C * HWp + 4 * N * C * I,
        transcendentals=N * C,
        bytes_accessed=2 * N * C * HWp * itemsize
        + HWp * itemsize + (2 * C * I + C + I) * 4,
    )

    out_flat = pl.pallas_call(
        kernel,
        out_shape=jax.ShapeDtypeStruct((N, C, HWp), x.dtype),
        grid_spec=pltpu.PrefetchScalarGridSpec(
            num_scalar_prefetch=0,
            grid=grid,
            in_specs=[
                pl.BlockSpec((TN, C, HWp), lambda n: (n, 0, 0)),
                pl.BlockSpec((HWp, 1), lambda n: (0, 0)),
                pl.BlockSpec((C, I), lambda n: (0, 0)),
                pl.BlockSpec((1, I), lambda n: (0, 0)),
                pl.BlockSpec((I, C), lambda n: (0, 0)),
                pl.BlockSpec((1, C), lambda n: (0, 0)),
            ],
            out_specs=pl.BlockSpec((TN, C, HWp), lambda n: (n, 0, 0)),
        ),
        compiler_params=pltpu.CompilerParams(
            dimension_semantics=("parallel",),
            vmem_limit_bytes=vmem_limit,
        ),
        cost_estimate=cost,
    )(x_flat, ones_col, wd_t, bd2, wu_t, bu2)

    if HWp != HW:
        out_flat = out_flat[:, :, :HW]
    return out_flat.reshape(N, C, H, W)


def se_block_ref(x, w_down, b_down, w_up, b_up):
    """Plain-JAX reference of the PyTorch forward (square spatial, global pool)."""
    N, C, H, W = x.shape
    I = w_down.shape[0]
    pooled = jnp.mean(x.astype(jnp.float32), axis=(2, 3))           # (N, C)
    h = jnp.maximum(pooled @ w_down.reshape(I, C).astype(jnp.float32).T
                    + b_down.astype(jnp.float32), 0.0)
    s = jax.nn.sigmoid(h @ w_up.reshape(C, I).astype(jnp.float32).T
                       + b_up.astype(jnp.float32))                  # (N, C)
    return x * s[:, :, None, None].astype(x.dtype)


if __name__ == "__main__":
    # Small shapes consistent with the module: batch=2, channels=4,
    # spatial=16x16 (avg_pool2d with kernel_size=W assumes square spatial),
    # internal_neurons=8.
    N, C, H, W = 2, 4, 16, 16
    INTERNAL = 8

    key = jax.random.PRNGKey(0)
    kx, kwd, kbd, kwu, kbu = jax.random.split(key, 5)

    x = jax.random.normal(kx, (N, C, H, W), dtype=jnp.float32)
    # Conv2d parameter shapes: (out, in, 1, 1).
    w_down = jax.random.normal(kwd, (INTERNAL, C, 1, 1), dtype=jnp.float32) * 0.5
    b_down = jax.random.normal(kbd, (INTERNAL,), dtype=jnp.float32) * 0.1
    w_up = jax.random.normal(kwu, (C, INTERNAL, 1, 1), dtype=jnp.float32) * 0.5
    b_up = jax.random.normal(kbu, (C,), dtype=jnp.float32) * 0.1

    out = jax.block_until_ready(se_block(x, w_down, b_down, w_up, b_up))

    ref = se_block_ref(x, w_down, b_down, w_up, b_up)
    assert out.shape == (N, C, H, W)
    assert jnp.allclose(out, ref, atol=1e-5, rtol=1e-5), "mismatch vs reference"

    print("KERNEL_OK")
</pallas_src>

<mosaic_0001>
module attributes {stable_mosaic.version = 11 : i64} {
  func.func @kernel(%arg0: i32, %arg1: memref<1x4x256xf32, #tpu.memory_space<vmem>>, %arg2: memref<256x1xf32, #tpu.memory_space<vmem>>, %arg3: memref<4x8xf32, #tpu.memory_space<vmem>>, %arg4: memref<1x8xf32, #tpu.memory_space<vmem>>, %arg5: memref<8x4xf32, #tpu.memory_space<vmem>>, %arg6: memref<1x4xf32, #tpu.memory_space<vmem>>, %arg7: memref<1x4x256xf32, #tpu.memory_space<vmem>>) attributes {dimension_semantics = [#tpu.dimension_semantics<parallel>], iteration_bounds = array<i64: 2>, scalar_prefetch = 0 : i64, scratch_operands = 0 : i64, tpu.core_type = #tpu.core_type<tc>, window_params = [{transform_indices = @transform_0, window_bounds = array<i64: 1, 4, 256>}, {pipeline_mode = #tpu.pipeline_mode<synchronous>, transform_indices = @transform_1, window_bounds = array<i64: 256, 1>}, {pipeline_mode = #tpu.pipeline_mode<synchronous>, transform_indices = @transform_2, window_bounds = array<i64: 4, 8>}, {pipeline_mode = #tpu.pipeline_mode<synchronous>, transform_indices = @transform_3, window_bounds = array<i64: 1, 8>}, {pipeline_mode = #tpu.pipeline_mode<synchronous>, transform_indices = @transform_4, window_bounds = array<i64: 8, 4>}, {pipeline_mode = #tpu.pipeline_mode<synchronous>, transform_indices = @transform_5, window_bounds = array<i64: 1, 4>}, {transform_indices = @transform_6, window_bounds = array<i64: 1, 4, 256>}]} {
    %c0 = arith.constant 0 : index
    %c0_0 = arith.constant 0 : index
    %c0_1 = arith.constant 0 : index
    %0 = vector.load %arg1[%c0, %c0_0, %c0_1] : memref<1x4x256xf32, #tpu.memory_space<vmem>>, vector<1x4x256xf32>
    %c0_2 = arith.constant 0 : index
    %c0_3 = arith.constant 0 : index
    %1 = vector.load %arg2[%c0_2, %c0_3] : memref<256x1xf32, #tpu.memory_space<vmem>>, vector<256x1xf32>
    %2 = vector.shape_cast %1 : vector<256x1xf32> to vector<1x256x1xf32>
    "tpu.trace_start"() <{level = 10 : i32, message = "nch,nhk->nck"}> : () -> ()
    %cst = arith.constant dense<0.000000e+00> : vector<1x4x1xf32>
    %3 = tpu.matmul %0, %2, %cst {dimension_numbers = #tpu.dot_dimension_numbers<[2], [1], [1], [2], [0, 0, 0, 1, 1, 2], [0], [0]>} : vector<1x4x256xf32>, vector<1x256x1xf32>, vector<1x4x1xf32> -> vector<1x4x1xf32>
    "tpu.trace_stop"() : () -> ()
    %cst_4 = arith.constant dense<0.000000e+00> : vector<1x4xf32>
    %4 = vector.multi_reduction <add>, %3, %cst_4 [2] : vector<1x4x1xf32> to vector<1x4xf32>
    %cst_5 = arith.constant 3.906250e-03 : f32
    %5 = vector.broadcast %cst_5 : f32 to vector<1x4xf32>
    %6 = arith.mulf %4, %5 : vector<1x4xf32>
    %c0_6 = arith.constant 0 : index
    %c0_7 = arith.constant 0 : index
    %7 = vector.load %arg3[%c0_6, %c0_7] : memref<4x8xf32, #tpu.memory_space<vmem>>, vector<4x8xf32>
    %cst_8 = arith.constant dense<0.000000e+00> : vector<1x8xf32>
    %8 = tpu.matmul %6, %7, %cst_8 {dimension_numbers = #tpu.dot_dimension_numbers<[1], [0], [0], [1], [0, 0, 1, 1], [], []>} : vector<1x4xf32>, vector<4x8xf32>, vector<1x8xf32> -> vector<1x8xf32>
    %c0_9 = arith.constant 0 : index
    %c0_10 = arith.constant 0 : index
    %9 = vector.load %arg4[%c0_9, %c0_10] : memref<1x8xf32, #tpu.memory_space<vmem>>, vector<1x8xf32>
    %10 = arith.addf %8, %9 : vector<1x8xf32>
    %cst_11 = arith.constant 0.000000e+00 : f32
    %11 = vector.broadcast %cst_11 : f32 to vector<1x8xf32>
    %12 = arith.maximumf %10, %11 : vector<1x8xf32>
    %c0_12 = arith.constant 0 : index
    %c0_13 = arith.constant 0 : index
    %13 = vector.load %arg5[%c0_12, %c0_13] : memref<8x4xf32, #tpu.memory_space<vmem>>, vector<8x4xf32>
    %cst_14 = arith.constant dense<0.000000e+00> : vector<1x4xf32>
    %14 = tpu.matmul %12, %13, %cst_14 {dimension_numbers = #tpu.dot_dimension_numbers<[1], [0], [0], [1], [0, 0, 1, 1], [], []>} : vector<1x8xf32>, vector<8x4xf32>, vector<1x4xf32> -> vector<1x4xf32>
    %c0_15 = arith.constant 0 : index
    %c0_16 = arith.constant 0 : index
    %15 = vector.load %arg6[%c0_15, %c0_16] : memref<1x4xf32, #tpu.memory_space<vmem>>, vector<1x4xf32>
    %16 = arith.addf %14, %15 : vector<1x4xf32>
    %17 = arith.negf %16 : vector<1x4xf32>
    %18 = math.exp %17 : vector<1x4xf32>
    %cst_17 = arith.constant 1.000000e+00 : f32
    %19 = vector.broadcast %cst_17 : f32 to vector<1x4xf32>
    %20 = arith.addf %19, %18 : vector<1x4xf32>
    %21 = arith.divf %19, %20 : vector<1x4xf32>
    %22 = vector.shape_cast %21 : vector<1x4xf32> to vector<1x4x1xf32>
    %23 = vector.broadcast %22 : vector<1x4x1xf32> to vector<1x4x256xf32>
    %24 = arith.mulf %0, %23 : vector<1x4x256xf32>
    %c0_18 = arith.constant 0 : index
    %c0_19 = arith.constant 0 : index
    %c0_20 = arith.constant 0 : index
    %25 = vector.load %arg7[%c0_18, %c0_19, %c0_20] : memref<1x4x256xf32, #tpu.memory_space<vmem>>, vector<1x4x256xf32>
    tpu.vector_store %arg7[%c0_18, %c0_19, %c0_20], %24 {strides = array<i32>} : memref<1x4x256xf32, #tpu.memory_space<vmem>>, vector<1x4x256xf32>,
    return
  }
  func.func @transform_0(%arg0: i32) -> (i32, i32, i32) {
    %c0_i32 = arith.constant 0 : i32
    %c0_i32_0 = arith.constant 0 : i32
    %c0_i32_1 = arith.constant 0 : i32
    return %arg0, %c0_i32, %c0_i32_0 : i32, i32, i32
  }
  func.func @transform_1(%arg0: i32) -> (i32, i32) {
    %c0_i32 = arith.constant 0 : i32
    %c0_i32_0 = arith.constant 0 : i32
    %c0_i32_1 = arith.constant 0 : i32
    return %c0_i32, %c0_i32_0 : i32, i32
  }
  func.func @transform_2(%arg0: i32) -> (i32, i32) {
    %c0_i32 = arith.constant 0 : i32
    %c0_i32_0 = arith.constant 0 : i32
    %c0_i32_1 = arith.constant 0 : i32
    return %c0_i32, %c0_i32_0 : i32, i32
  }
  func.func @transform_3(%arg0: i32) -> (i32, i32) {
    %c0_i32 = arith.constant 0 : i32
    %c0_i32_0 = arith.constant 0 : i32
    %c0_i32_1 = arith.constant 0 : i32
    return %c0_i32, %c0_i32_0 : i32, i32
  }
  func.func @transform_4(%arg0: i32) -> (i32, i32) {
    %c0_i32 = arith.constant 0 : i32
    %c0_i32_0 = arith.constant 0 : i32
    %c0_i32_1 = arith.constant 0 : i32
    return %c0_i32, %c0_i32_0 : i32, i32
  }
  func.func @transform_5(%arg0: i32) -> (i32, i32) {
    %c0_i32 = arith.constant 0 : i32
    %c0_i32_0 = arith.constant 0 : i32
    %c0_i32_1 = arith.constant 0 : i32
    return %c0_i32, %c0_i32_0 : i32, i32
  }
  func.func @transform_6(%arg0: i32) -> (i32, i32, i32) {
    %c0_i32 = arith.constant 0 : i32
    %c0_i32_0 = arith.constant 0 : i32
    %c0_i32_1 = arith.constant 0 : i32
    return %arg0, %c0_i32, %c0_i32_0 : i32, i32, i32
  }
}

</mosaic_0001>

<bundles_post_ra>
// kernel: tpu_custom_call.1
= control target key start
LH: loop header
LB: loop body
LE: loop exit
PB: predicated region body
PF: predicated region fallthrough
CT: control target
= control target key end

     0   :  { %11 = vsyncpa [#allocation3], 0  ;;  %s1088_s0 = inlined_call_operand.vmem [shape: f32[2,4,256], index: 0, kind: input, shape index: {}]   ;;  %s1089_s1 = inlined_call_operand.vmem [shape: f32[256,1], index: 1, kind: input, shape index: {}]   ;;  %s1090_s2 = inlined_call_operand.vmem [shape: f32[4,8], index: 2, kind: input, shape index: {}]   ;;  %s1091_s3 = inlined_call_operand.vmem [shape: f32[1,8], index: 3, kind: input, shape index: {}]   ;;  %s1092_s4 = inlined_call_operand.vmem [shape: f32[8,4], index: 4, kind: input, shape index: {}]   ;;  %s1093_s5 = inlined_call_operand.vmem [shape: f32[1,4], index: 5, kind: input, shape index: {}]   ;;  %s1094_s6 = inlined_call_operand.hbm [shape: f32[2,4,256], index: 6, kind: output, shape index: {}]  }
   0x1   :  { %13 = vsyncpa [#allocation3 + $0x1], 0  ;;  %s874_s21 = smov 0   ;;  %s876_s22 = smov 0  }
   0x2   :  { %s878_s23 = smov 0   ;;  %s880_s24 = smov 0  }
   0x3 LB: > { %s895_s25 = sadd.s32 4294967295, %s832_s24   ;;  %s622_s26 = sadd.s32 4294967294, %s832_s24   ;;  %s832_s24 = sphi %s880_s24, %s1100_s24   ;;  %s828_s23 = sphi %s878_s23, %s1099_s23   ;;  %s824_s22 = sphi %s876_s22, %s1098_s22   ;;  %s820_s21 = sphi %s874_s21, %s1097_s21  }
   0x4   : > { %s899_s27 = sadd.s32 1, %s832_s24   ;;  %s157_s28 = sadd.s32 1, %s828_s23 }
   0x5   : > { %s154_s29 = ssub.s32 %s832_s24, %s899_s27  ;;  %p167_p0 = scmp.ne.s32.totalorder %s828_s23, %s824_s22 }
   0x6   : > { %p155_p1 = scmp.eq.s32.totalorder %s154_s29, 0  ;;  %p168_p2 = scmp.eq.s32.totalorder %s895_s25, 1 }
   0x7   : > { %p173_p3 = scmp.ne.s32.totalorder %s824_s22, %s820_s21  ;;  %p174_p4 = scmp.eq.s32.totalorder %s622_s26, 1 }
   0x8   : > { %s910_s30 = scalar_select %p155_p1, %s828_s23, %s157_s28  }
   0x9   : > { %p912_p5 = por %p168_p2, %p167_p0  ;;  %p916_p6 = por %p174_p4, %p173_p3 }
   0xa   : > { %p625_p7 = scmp.ge.s32.totalorder %s832_s24, 1  ;;  %p215_p8 = scmp.lt.s32.totalorder %s832_s24, 3 }
   0xc   : > { %p216_p9 = pnand %p625_p7, %p215_p8 }
   0xd   : > { %v267_v0 = vld [vmem:[%s1089_s1 + $0x80] sm:$0xff] (!%p216_p9)  ;;  %v268_v1 = vld [vmem:[%s1089_s1 + $0x88] sm:$0xff] (!%p216_p9)  ;;  %p245_p10 = scmp.lt.s32.totalorder (!%p216_p9), %s895_s25, 1  ;;  %v269_v5 = vld [vmem:[%s1089_s1 + $0x90] sm:$0xff] (!%p216_p9)  ;;  %v834_v50 = vmov (!%p216_p9), 0   ;;  %v835_v55 = vmov (!%p216_p9), 0.0   ;;  %v364_v57 = vlaneseq (!%p216_p9) }
   0xe   : > { %219 = sbr.rel (%p216_p9) target bundleno = 986 (0x3da), region = 44  ;;  %v251_v2 = vld [vmem:[%s1089_s1] sm:$0xff] (!%p216_p9)  ;;  %v689_v3 = vpack.c.bf16 (!%p216_p9), %v268_v1, %v267_v0  ;;  %v252_v4 = vld [vmem:[%s1089_s1 + $0x8] sm:$0xff] (!%p216_p9)  ;;  %v270_v6 = vld [vmem:[%s1089_s1 + $0x98] sm:$0xff] (!%p216_p9)  ;;  %764 = vset.pattern.permute.xlu0 (!%p216_p9), %v834_v50  ;;  %679 = vmatprep.subr.mxu1 (!%p216_p9), %v835_v55  ;;  %vm373_vm0 = vcmask (!%p216_p9), 1043456   ;;  %vm836_vm1 = vmmov (!%p216_p9), 0  }
   0xf   : > { %v691_v7 = vpack.c.bf16 (!%p216_p9), %v252_v4, %v251_v2  ;;  %v693_v8 = vpack.c.bf16 (!%p216_p9), %v270_v6, %v269_v5  ;;  %v253_v9 = vld [vmem:[%s1089_s1 + $0x10] sm:$0xff] (!%p216_p9)  ;;  %v254_v10 = vld [vmem:[%s1089_s1 + $0x18] sm:$0xff] (!%p216_p9)  ;;  %v271_v11 = vld [vmem:[%s1089_s1 + $0xa0] sm:$0xff] (!%p216_p9)  ;;  %681 = vmatprep.mubr.msk.f32.mxu1 (!%p216_p9), %vm836_vm1, %v835_v55  ;;  %v365_v58 = vand.u32 (!%p216_p9), 127, %v364_v57  ;;  %v367_v59 = vshrl.u32 (!%p216_p9), %v364_v57, 7  ;;  %s639_s13 = sshll.u32 (!%p216_p9), %s895_s25, 7 }
  0x10   : > { %690 = vmatprep.subr.bf16.mxu0 (!%p216_p9), %v689_v3  ;;  %v272_v12 = vld [vmem:[%s1089_s1 + $0xa8] sm:$0xff] (!%p216_p9)  ;;  %v695_v13 = vpack.c.bf16 (!%p216_p9), %v254_v10, %v253_v9  ;;  %v255_v15 = vld [vmem:[%s1089_s1 + $0x20] sm:$0xff] (!%p216_p9)  ;;  %v273_v17 = vld [vmem:[%s1089_s1 + $0xb0] sm:$0xff] (!%p216_p9)  ;;  %vm370_vm2 = vcmask (!%p216_p9), 31744   ;;  %vm450_vm3 = vcmask (!%p216_p9), 64512   ;;  %s1046_s19 = scalar_lea.hbm (!%p216_p9), %s1094_s6, %s639_s13 }
  0x11   : > { %692 = vmatpush3.bf16.msra.mxu0 (!%p216_p9), %v691_v7  ;;  %v697_v14 = vpack.c.bf16 (!%p216_p9), %v272_v12, %v271_v11  ;;  %v256_v16 = vld [vmem:[%s1089_s1 + $0x28] sm:$0xff] (!%p216_p9)  ;;  %v274_v18 = vld [vmem:[%s1089_s1 + $0xb8] sm:$0xff] (!%p216_p9)  ;;  %v257_v21 = vld [vmem:[%s1089_s1 + $0x30] sm:$0xff] (!%p216_p9)  ;;  %v368_v60 = vsub.s32 (!%p216_p9), %v365_v58, %v367_v59  ;;  %v532_v12 = vsub.s32 (!%p216_p9), 0, %v367_v59 }
  0x12   : > { %694 = vmatprep.subr.bf16.mxu0 (!%p216_p9), %v693_v8  ;;  %v699_v19 = vpack.c.bf16 (!%p216_p9), %v256_v16, %v255_v15  ;;  %v701_v20 = vpack.c.bf16 (!%p216_p9), %v274_v18, %v273_v17  ;;  %v258_v22 = vld [vmem:[%s1089_s1 + $0x38] sm:$0xff] (!%p216_p9)  ;;  %v275_v23 = vld [vmem:[%s1089_s1 + $0xc0] sm:$0xff] (!%p216_p9)  ;;  %v276_v24 = vld [vmem:[%s1089_s1 + $0xc8] sm:$0xff] (!%p216_p9)  ;;  %v837_v15 = vmov (!%p216_p9), 839922192  }
  0x13   : > { %v703_v27 = vpack.c.bf16 (!%p216_p9), %v258_v22, %v257_v21  ;;  %v705_v28 = vpack.c.bf16 (!%p216_p9), %v276_v24, %v275_v23  ;;  %v259_v29 = vld [vmem:[%s1089_s1 + $0x40] sm:$0xff] (!%p216_p9)  ;;  %v260_v30 = vld [vmem:[%s1089_s1 + $0x48] sm:$0xff] (!%p216_p9)  ;;  %v277_v31 = vld [vmem:[%s1089_s1 + $0xd0] sm:$0xff] (!%p216_p9)  ;;  %v539_v16 = vunpack.c.l.s4 (!%p216_p9), %v837_v15 }
  0x14   : > { %v278_v32 = vld [vmem:[%s1089_s1 + $0xd8] sm:$0xff] (!%p216_p9)  ;;  %v707_v33 = vpack.c.bf16 (!%p216_p9), %v260_v30, %v259_v29  ;;  %v261_v35 = vld [vmem:[%s1089_s1 + $0x50] sm:$0xff] (!%p216_p9)  ;;  %v279_v37 = vld [vmem:[%s1089_s1 + $0xe0] sm:$0xff] (!%p216_p9) }
  0x15   : > { %s246_s12 = scalar_select %p245_p10, %s895_s25, 1  ;;  %696 = vmatpush3.bf16.msra.mxu0 %v695_v13  ;;  %v709_v34 = vpack.c.bf16 %v278_v32, %v277_v31  ;;  %v262_v36 = vld [vmem:[%s1089_s1 + $0x58] sm:$0xff]  ;;  %v280_v38 = vld [vmem:[%s1089_s1 + $0xe8] sm:$0xff]  ;;  %v263_v41 = vld [vmem:[%s1089_s1 + $0x60] sm:$0xff]  ;;  %v540_v17 = vunpack.c.0.s8 %v539_v16 }
  0x16   : > { %698 = vmatprep.subr.bf16.mxu0 %v697_v14  ;;  %v711_v39 = vpack.c.bf16 %v262_v36, %v261_v35  ;;  %v713_v40 = vpack.c.bf16 %v280_v38, %v279_v37  ;;  %v264_v42 = vld [vmem:[%s1089_s1 + $0x68] sm:$0xff]  ;;  %v281_v43 = vld [vmem:[%s1089_s1 + $0xf0] sm:$0xff]  ;;  %v282_v44 = vld [vmem:[%s1089_s1 + $0xf8] sm:$0xff]  ;;  %s838_s25 = smov [#allocation2]  }
  0x17   : > { %s638_s15 = sshll.u32 %s246_s12, 3  ;;  %v715_v45 = vpack.c.bf16 %v264_v42, %v263_v41  ;;  %v717_v46 = vpack.c.bf16 %v282_v44, %v281_v43  ;;  %v265_v47 = vld [vmem:[%s1089_s1 + $0x70] sm:$0xff]  ;;  %v266_v48 = vld [vmem:[%s1089_s1 + $0x78] sm:$0xff]  ;;  %v358_v56 = vld [vmem:[%s1090_s2] sm:$0xf]  ;;  %v543_v18 = vsub.s32 %v540_v17, %v367_v59  ;;  %s774_s26 = sshll.u32 %s838_s25, 4  ;;  %s775_s26 = int_to_ptr.vmem [resolvable:$false] %s774_s26 }
  0x18   : > { %s249_s11 = scalar_lea.vmem %s1088_s0, %s638_s15  ;;  %v719_v49 = vpack.c.bf16 %v266_v48, %v265_v47  ;;  %680 = vmatpush3.msk.msra.mxu1 %vm373_vm0, %v358_v56  ;;  %v448_v63 = vld [vmem:[%s1092_s4] sm:$0xff]  ;;  %s776_s28 = scalar_lea.vmem %s775_s26, 256 }
  0x19   : > { %v981_v25 = vld [vmem:[%s249_s11] sm:$0xff]  ;;  %700 = vmatpush3.bf16.msra.mxu0 %v699_v19  ;;  %684 = vmatprep.subr.mxu1 %v835_v55  ;;  %s242_s11 = sand.u32 1, %s824_s22  }
  0x1a   : > { %v284_v26 = vcombine.high %v981_v25, %v981_v25  ;;  %702 = vmatprep.subr.bf16.mxu0 %v701_v20  ;;  %v359_v0 = vld [vmem:[%s1091_s3] sm:$0x1]  ;;  %s626_s12 = sshll.u32 %s242_s11, 3  ;;  %s549_s20 = scalar_lea.sflag [#allocation3], %s242_s11 }
  0x1b   : > { %v449_v5 = vld [vmem:[%s1093_s5] sm:$0x1]  ;;  %s244_s14 = scalar_lea.vmem [#allocation2], %s626_s12 }
  0x1c   : > { %350 = vmatprep.mubr.f32.mxu0 %v284_v26  ;;  %s563_s16 = sshll.u32 %s244_s14, 4  ;;  %s1048_s16 = int_to_ptr.vmem [resolvable:$true] %s563_s16 }
  0x1d   : > { %704 = vmatpush3.bf16.msra.mxu0 %v703_v27  ;;  %s770_s15 = scalar_lea.vmem %s1048_s16, 128  ;;  %p777_p0 = scmp.lt.s32.totalorder %s1048_s16, %s775_s26 }
  0x1e   : > { %706 = vmatprep.subr.bf16.mxu0 %v705_v28  ;;  %p771_p11 = scmp.ne.s32.totalorder %s1048_s16, %s770_s15  ;;  %p778_p1 = scmp.lt.s32.totalorder %s776_s28, %s770_s15 }
  0x20   : > { %p772_p12 = pnand %p771_p11, %p912_p5  ;;  %p779_p2 = por %p778_p1, %p777_p0 }
  0x21   : > { %708 = vmatpush3.bf16.msra.mxu0 %v707_v33 }
  0x22   : > { %710 = vmatprep.subr.bf16.mxu0 %v709_v34  ;;  %p773_p13 = pneg %p772_p12 }
  0x24   : > { %p780_p3 = pnand %p779_p2, %p773_p13 }
  0x25   : > { %712 = vmatpush3.bf16.msra.mxu0 %v711_v39 }
  0x26   : > { %714 = vmatprep.subr.bf16.mxu0 %v713_v40 }
  0x29   : > { %716 = vmatpush3.bf16.msra.mxu0 %v715_v45 }
  0x2a   : > { %718 = vmatprep.subr.bf16.mxu0 %v717_v46 }
  0x2d   : > { %720 = vmatpush3.bf16.msra.mxu0 %v719_v49 }
  0x30   : > { %351 = vmatmul.mubr.f32.vlgmr.msra.gmra.mrb[0].mxu0 %v981_v25 }
 0x103   : > { %v672_v51 = vpop.f32.mrb[0].mxu0 }
 0x104   : > { %v673_v52 = vpop.f32.mrb[1].mxu0 }
 0x105   : > { %v674_v53 = vadd.f32 %v673_v52, %v672_v51 }
 0x107   : > { %v357_v54 = vmul.f32 0.00390625, %v674_v53 }
 0x109   : > { %362 = vperm.xlu0 %764, %v357_v54  }
 0x188   : > { %v363_v61 = vpop.permute.xlu0 %362 }
 0x189   : > { %v369_v62 = vrot.slane %v363_v61, %v368_v60 }
 0x18b   : > { %682 = vmatmul.mubr.msk.f32.vlgmr.msra.gmra.mrb[0].mxu1 %vm370_vm2, %v369_v62 }
 0x18c   : > { %686 = vmatprep.mubr.msk.f32.mxu1 %vm836_vm1, %v835_v55  ;;  %685 = vmatpush3.msra.mxu1 %v448_v63 }
 0x25e   : > { %v443_v1 = vpop.f32.mrb[0].mxu1 }
 0x25f   : > { %v444_v2 = vadd.f32 %v443_v1, %v359_v0  ;;  %v683_v3 = vpop.f32.mrb[1].mxu1 }
 0x261   : > { %v447_v4 = vmax.f32 %v444_v2, 0.0 }
 0x263   : > { %687 = vmatmul.mubr.msk.f32.vlgmr.msra.gmra.mrb[2].mxu1 %vm450_vm3, %v447_v4 }
 0x336   : > { %v520_v6 = vpop.f32.mrb[2].mxu1 }
 0x337   : > { %v521_v7 = vadd.f32 %v520_v6, %v449_v5  ;;  %v688_v8 = vpop.f32.mrb[3].mxu1 }
 0x339   : > { %v632_v9 = vmul.f32 -1.442695, %v521_v7 }
 0x33b   : > { %766 = vpow2.f32 %v632_v9 }
 0x345   : > { %v767_v10 = vpop.eup %766 }
 0x346   : > { %v527_v11 = vadd.f32 1.0, %v767_v10 }
 0x348   : > { %768 = vrcp.f32 %v527_v11 }
 0x352   : > { %v769_v13 = vpop.eup %768 }
 0x353   : > { %v533_v14 = vrot.slane %v769_v13, %v532_v12 }
 0x355   : > { %535 = vbcast.lane.b32.xlu0 %v533_v14, 256 }
 0x3c7   : > { %v536_v19 = vpop.permute.xlu0 %535 }
 0x3c8   : > { %v544_v20 = vrot.slane %v536_v19, %v543_v18 }
 0x3ca   : > { %v546_v21 = vmul.f32 %v544_v20, %v981_v25 }
 0x3cc   : > { %547 = vst [vmem:[%s244_s14] sm:$0xff] %v546_v21 }
 0x3cd   : > { %783 = shalt.err (!%p780_p3)
}
 0x3ce   : > { %s784_s29 = scalar_lea.hbm %s1046_s19, 128  ;;  %s788_s11 = scalar_lea.hbm %s1094_s6, 256 }
 0x3cf   : > { %p785_p4 = scmp.ne.s32.totalorder %s1046_s19, %s784_s29  ;;  %p789_p9 = scmp.lt.u32.totalorder %s1046_s19, %s1094_s6 }
 0x3d0   : > { %p790_p10 = scmp.lt.u32.totalorder %s788_s11, %s784_s29  ;;  %p792_p12 = scmp.lt.u32.totalorder %s784_s29, %s1046_s19 }
 0x3d1   : > { %p786_p7 = pnand %p785_p4, %p912_p5 }
 0x3d2   : > { %p791_p11 = por %p790_p10, %p789_p9 }
 0x3d3   : > { %p787_p8 = pneg %p786_p7 }
 0x3d4   : > { %p793_p13 = por %p792_p12, %p791_p11 }
 0x3d6   : > { %p794_p0 = pnand %p793_p13, %p787_p8 }
 0x3d8   : > { %797 = shalt.err (!%p794_p0)
}
 0x3d9   : > { %721 = dma.vmem_to_hbm [thread:$0]  (%p912_p5), %s1048_s16, 128, %s1046_s19, %s549_s20  }
 0x3da PF: > { %p727_p1 = scmp.ge.s32.totalorder %s832_s24, 2  ;;  %s575_s14 = sand.u32 1, %s820_s21  }
 0x3db   : > { %s576_s17 = scalar_lea.sflag [#allocation3], %s575_s14 }
 0x3dc   : > { %p724_p2 = pnand %p727_p1, %p916_p6 }
 0x3de   : > { %815 = dma.done.wait (!%p724_p2), %s576_s17, 128  }
 0x3df   : > { %817 = vsyncadd (!%p724_p2), %s576_s17, 4294967168  ;;  %p16_p3 = scmp.ge.s32.totalorder %s899_s27, 4   ;;  %s1097_s21 = smov %s824_s22 }
 0x3e0   : > { %s1098_s22 = smov %s828_s23  ;;  %s1099_s23 = smov %s910_s30 }
 0x3e1   : > { %s1100_s24 = smov %s899_s27  ;;  %18 = sbr.rel (!%p16_p3) target bundleno = 3 (0x3), region = 79 }
 0x3e8   :  { %581 = vsyncpa [#allocation3], 1 }
 0x3e9   :  { %583 = vsyncpa [#allocation3 + $0x1], 1 }

</bundles_post_ra>
